<compile_context>
chip_gen: v7x
topology: tpu7x:2x2x1
jax: 0.10.0
libtpu: 0.0.40
codegen_flags: <defaults>
</compile_context>

<pallas_src>
import jax
import jax.numpy as jnp
from jax import lax
from jax.experimental import pallas as pl
from jax.experimental.pallas import tpu as pltpu


def _linear_o1_kernel(x_ref, w_ref, b_ref, o_ref):
    # x_ref: (TB, F) f32   w_ref: (1, F) f32   b_ref: SMEM (1,) f32   o_ref: (TB, 1)
    prod = x_ref[...] * w_ref[...]                    # VPU, broadcast over batch rows
    acc = jnp.sum(prod, axis=-1, keepdims=True)       # XLU lane reduce
    o_ref[...] = (acc + b_ref[0]).astype(o_ref.dtype)


def _linear_mxu_kernel(x_ref, w_ref, b_ref, o_ref):
    # Fallback for wider heads (O > 1): contract on F directly, no wrapper transpose.
    # x_ref: (TB, F)   w_ref: (O, F)   b_ref: (1, O)   o_ref: (TB, O)
    acc = lax.dot_general(
        x_ref[...], w_ref[...],
        dimension_numbers=(((1,), (1,)), ((), ())),
        preferred_element_type=jnp.float32)
    o_ref[...] = (acc + b_ref[...]).astype(o_ref.dtype)


def _batch_tile(B):
    # Single block (== full dim) for small batches; sublane-aligned tile for
    # large ones.  2 * 512 * 784 * 4B ≈ 3.2 MiB of double-buffered x — safely
    # inside v7x's 64 MiB VMEM (32 MiB default scoped limit).
    return B if B <= 512 else 512


def simplenet_forward(image, weight, bias):
    """image: (B, C, H, W) f32; weight: (O, F), F == C*H*W; bias: (O,) -> (B, O)."""
    B = image.shape[0]
    O, F = weight.shape
    x = image.reshape(B, F)                 # == torch.flatten(start_dim=1)
    tb = _batch_tile(B)
    grid = (pl.cdiv(B, tb),)
    cparams = pltpu.CompilerParams(dimension_semantics=("parallel",))

    if O == 1:
        return pl.pallas_call(
            _linear_o1_kernel,
            out_shape=jax.ShapeDtypeStruct((B, O), jnp.float32),
            grid=grid,
            in_specs=[
                pl.BlockSpec((tb, F), lambda i: (i, 0)),
                pl.BlockSpec((O, F), lambda i: (0, 0)),
                pl.BlockSpec(memory_space=pltpu.MemorySpace.SMEM),  # bias scalar
            ],
            out_specs=pl.BlockSpec((tb, O), lambda i: (i, 0)),
            compiler_params=cparams,
        )(x, weight, bias)

    # General O > 1 path (MXU).  Keep f32 here; cast to bf16 only if this ever
    # becomes a large matmul on v6e/v7x.
    return pl.pallas_call(
        _linear_mxu_kernel,
        out_shape=jax.ShapeDtypeStruct((B, O), jnp.float32),
        grid=grid,
        in_specs=[
            pl.BlockSpec((tb, F), lambda i: (i, 0)),
            pl.BlockSpec((O, F), lambda i: (0, 0)),
            pl.BlockSpec((1, O), lambda i: (0, 0)),
        ],
        out_specs=pl.BlockSpec((tb, O), lambda i: (i, 0)),
        compiler_params=cparams,
    )(x, weight, bias.reshape(1, O))


def init_params(key, im_chan, n_classes):
    """Deterministic init matching nn.Linear's U(-1/sqrt(fan_in), 1/sqrt(fan_in))."""
    kw, kb = jax.random.split(key)
    bound = 1.0 / jnp.sqrt(jnp.float32(im_chan))
    weight = jax.random.uniform(kw, (n_classes, im_chan), jnp.float32, -bound, bound)
    bias = jax.random.uniform(kb, (n_classes,), jnp.float32, -bound, bound)
    return weight, bias


if __name__ == "__main__":
    key = jax.random.PRNGKey(0)
    k_img, k_par = jax.random.split(key)

    # Shapes consistent with the module docstring: (batch, 1, 28, 28), n_classes=1.
    B, C, H, W = 2, 1, 28, 28
    im_chan = C * H * W          # 784 — Linear in_features equals flattened size
    n_classes = 1

    image = jax.random.normal(k_img, (B, C, H, W), jnp.float32)
    weight, bias = init_params(k_par, im_chan, n_classes)

    out = simplenet_forward(image, weight, bias)
    out = jax.block_until_ready(out)

    # Reference check in plain JAX (same math as nn.Linear on flattened input).
    ref = image.reshape(B, -1) @ weight.T + bias
    assert out.shape == (B, n_classes)
    assert jnp.allclose(out, ref, atol=1e-5, rtol=1e-5)

    print("KERNEL_OK")
</pallas_src>

<mosaic_0001>
module attributes {stable_mosaic.version = 11 : i64} {
  func.func @_linear_o1_kernel(%arg0: i32, %arg1: memref<2x784xf32, #tpu.memory_space<vmem>>, %arg2: memref<1x784xf32, #tpu.memory_space<vmem>>, %arg3: memref<1xf32, #tpu.memory_space<smem>>, %arg4: memref<2x1xf32, #tpu.memory_space<vmem>>) attributes {dimension_semantics = [#tpu.dimension_semantics<parallel>], iteration_bounds = array<i64: 1>, scalar_prefetch = 0 : i64, scratch_operands = 0 : i64, tpu.core_type = #tpu.core_type<tc>, window_params = [{transform_indices = @transform_0, window_bounds = array<i64: 2, 784>}, {pipeline_mode = #tpu.pipeline_mode<synchronous>, transform_indices = @transform_1, window_bounds = array<i64: 1, 784>}, {transform_indices = @transform_2, window_bounds = array<i64: 1>}, {transform_indices = @transform_3, window_bounds = array<i64: 2, 1>}]} {
    %c0 = arith.constant 0 : index
    %c0_0 = arith.constant 0 : index
    %0 = vector.load %arg1[%c0, %c0_0] : memref<2x784xf32, #tpu.memory_space<vmem>>, vector<2x784xf32>
    %c0_1 = arith.constant 0 : index
    %c0_2 = arith.constant 0 : index
    %1 = vector.load %arg2[%c0_1, %c0_2] : memref<1x784xf32, #tpu.memory_space<vmem>>, vector<1x784xf32>
    %2 = vector.broadcast %1 : vector<1x784xf32> to vector<2x784xf32>
    %3 = arith.mulf %0, %2 : vector<2x784xf32>
    %cst = arith.constant dense<0.000000e+00> : vector<2xf32>
    %4 = vector.multi_reduction <add>, %3, %cst [1] : vector<2x784xf32> to vector<2xf32>
    %5 = vector.shape_cast %4 : vector<2xf32> to vector<2x1xf32>
    %c0_3 = arith.constant 0 : index
    %6 = memref.load %arg3[%c0_3] : memref<1xf32, #tpu.memory_space<smem>>
    %7 = vector.broadcast %6 : f32 to vector<2x1xf32>
    %8 = arith.addf %5, %7 : vector<2x1xf32>
    %c0_4 = arith.constant 0 : index
    %c0_5 = arith.constant 0 : index
    %9 = vector.load %arg4[%c0_4, %c0_5] : memref<2x1xf32, #tpu.memory_space<vmem>>, vector<2x1xf32>
    tpu.vector_store %arg4[%c0_4, %c0_5], %8 {strides = array<i32>} : memref<2x1xf32, #tpu.memory_space<vmem>>, vector<2x1xf32>,
    return
  }
  func.func @transform_0(%arg0: i32) -> (i32, i32) {
    %c0_i32 = arith.constant 0 : i32
    %c0_i32_0 = arith.constant 0 : i32
    return %arg0, %c0_i32 : i32, i32
  }
  func.func @transform_1(%arg0: i32) -> (i32, i32) {
    %c0_i32 = arith.constant 0 : i32
    %c0_i32_0 = arith.constant 0 : i32
    %c0_i32_1 = arith.constant 0 : i32
    return %c0_i32, %c0_i32_0 : i32, i32
  }
  func.func @transform_2(%arg0: i32) -> i32 {
    %c0_i32 = arith.constant 0 : i32
    %c0_i32_0 = arith.constant 0 : i32
    return %c0_i32 : i32
  }
  func.func @transform_3(%arg0: i32) -> (i32, i32) {
    %c0_i32 = arith.constant 0 : i32
    %c0_i32_0 = arith.constant 0 : i32
    return %arg0, %c0_i32 : i32, i32
  }
}

</mosaic_0001>

<bundles_post_ra>
// kernel: tpu_custom_call.1
= control target key start
LH: loop header
LB: loop body
LE: loop exit
PB: predicated region body
PF: predicated region fallthrough
CT: control target
= control target key end

     0   :  { %9 = vsyncpa [#allocation4], 0  ;;  %s191_s12 = smov [#allocation3]   ;;  %s240_s0 = inlined_call_operand.hbm [shape: f32[2,784], index: 0, kind: input, shape index: {}]   ;;  %s241_s1 = inlined_call_operand.vmem [shape: f32[1,784], index: 1, kind: input, shape index: {}]   ;;  %s242_s2 = inlined_call_operand.<no memory space> [shape: f32[1], index: 2, kind: input, shape index: {}]   ;;  %s243_s3 = inlined_call_operand.vmem [shape: f32[2,1], index: 3, kind: output, shape index: {}]  }
   0x1   :  { %s16_s13 = sshll.u32 %s191_s12, 4  ;;  %s167_s16 = scalar_lea.hbm %s240_s0, 224  ;;  %s17_s13 = int_to_ptr.vmem [resolvable:$true] %s16_s13 }
   0x2   :  { %p168_p0 = scmp.ne.s32.totalorder %s240_s0, %s167_s16  ;;  %p171_p1 = scmp.lt.u32.totalorder %s167_s16, %s240_s0 }
   0x4   :  { %p173_p2 = pnand %p171_p1, %p168_p0 }
   0x6   :  { %176 = shalt.err (!%p173_p2)
}
   0x7   :  { %s177_s21 = scalar_lea.vmem %s17_s13, 224  ;;  %p182_p4 = scmp.lt.s32.totalorder %s17_s13, %s17_s13 }
   0x8   :  { %p178_p3 = scmp.ne.s32.totalorder %s17_s13, %s177_s21  ;;  %p183_p5 = scmp.lt.s32.totalorder %s177_s21, %s177_s21 }
   0xa   :  { %p184_p6 = por %p183_p5, %p182_p4 }
   0xc   :  { %p185_p7 = pnand %p184_p6, %p178_p3 }
   0xe   :  { %188 = shalt.err (!%p185_p7)
}
   0xf   :  { %19 = dma.hbm_to_vmem [thread:$0]  %s240_s0, 224, %s17_s13, [#allocation4]  }
  0x10   :  { %189 = dma.done.wait [#allocation4], 224  }
  0x11   :  { %190 = vsyncadd [#allocation4], 4294967072  ;;  %v31_v0 = vlaneseq  ;;  %v192_v1 = vmov 1983009808   ;;  %v29_v12 = vld [vmem:[%s241_s1] sm:$0x7f]  ;;  %v156_v56 = vstv %s242_s2 }
  0x12   :  { %v62_v2 = vunpack.c.l.s4 %v192_v1  ;;  %v27_v27 = vld [vmem:[#allocation3] sm:$0xff]  ;;  %v28_v29 = vld [vmem:[#allocation3 + $0x8] sm:$0x3f]  ;;  %vm138_vm0 = vcmask 1041408   ;;  %vm150_vm1 = vcmask 123904   ;;  %vm158_vm2 = vcmask 1024  }
  0x13   :  { %v32_v3 = vshrl.u32 %v31_v0, 7 }
  0x14   :  { %v63_v4 = vunpack.c.0.s8 %v62_v2 }
  0x15   :  { %v33_v5 = vsub.s32 0, %v32_v3  ;;  %v37_v6 = vsub.s32 1, %v32_v3  ;;  %v41_v7 = vsub.s32 2, %v32_v3  ;;  %v45_v8 = vsub.s32 3, %v32_v3 }
  0x16   :  { %v49_v9 = vsub.s32 4, %v32_v3  ;;  %v53_v10 = vsub.s32 5, %v32_v3  ;;  %v57_v11 = vsub.s32 6, %v32_v3  ;;  %v66_v13 = vsub.s32 %v63_v4, %v32_v3 }
  0x17   :  { %v34_v14 = vrot.slane %v29_v12, %v33_v5  ;;  %v38_v15 = vrot.slane %v29_v12, %v37_v6  ;;  %v42_v16 = vrot.slane %v29_v12, %v41_v7  ;;  %v46_v17 = vrot.slane %v29_v12, %v45_v8 }
  0x18   :  { %v50_v18 = vrot.slane %v29_v12, %v49_v9  ;;  %v54_v19 = vrot.slane %v29_v12, %v53_v10  ;;  %v58_v20 = vrot.slane %v29_v12, %v57_v11 }
  0x19   :  { %v59_v21 = vcombine.low %v34_v14, %v38_v15  ;;  %v60_v22 = vcombine.low %v42_v16, %v46_v17 }
  0x1a   :  { %v76_v23 = vcombine.low %v50_v18, %v54_v19  ;;  %v90_v24 = vrot.slane %v58_v20, %v66_v13 }
  0x1b   :  { %v67_v25 = vrot.slane %v59_v21, %v66_v13  ;;  %v74_v26 = vrot.slane %v60_v22, %v66_v13 }
  0x1c   :  { %v83_v28 = vrot.slane %v76_v23, %v66_v13 }
  0x1d   :  { %v75_v30 = vcombine.low %v67_v25, %v74_v26 }
  0x1e   :  { %v91_v31 = vcombine.low %v83_v28, %v90_v24 }
  0x1f   :  { %v94_v32 = vmul.f32 %v75_v30, %v27_v27 }
  0x20   :  { %v95_v33 = vmul.f32 %v91_v31, %v28_v29 }
  0x21   :  { %v98_v34 = vcombine.high %v94_v32, %v94_v32  ;;  %v105_v35 = vrot.slane %v94_v32, %v66_v13 }
  0x22   :  { %v122_v38 = vrot.slane %v95_v33, %v66_v13  ;;  %v115_v41 = vcombine.high %v95_v33, %v95_v33 }
  0x23   :  { %v112_v36 = vrot.slane %v98_v34, %v66_v13  ;;  %v113_v37 = vcombine.high %v105_v35, %v105_v35  ;;  %v139_v39 = vsel %vm138_vm0, %v105_v35, 0.0 }
  0x24   :  { %v130_v45 = vcombine.high %v122_v38, %v122_v38  ;;  %v129_v48 = vrot.slane %v115_v41, %v66_v13  ;;  %v146_v49 = vsel %vm138_vm0, %v122_v38, 0.0 }
  0x25   :  { %v114_v40 = vcombine.high %v112_v36, %v112_v36  ;;  %v140_v42 = vsel %vm138_vm0, %v113_v37, 0.0  ;;  %v142_v43 = vsel %vm138_vm0, %v112_v36, 0.0 }
  0x26   :  { %v141_v44 = vadd.f32 %v140_v42, %v139_v39  ;;  %v148_v51 = vsel %vm138_vm0, %v130_v45, 0.0  ;;  %v151_v53 = vsel %vm150_vm1, %v129_v48, 0.0 }
  0x27   :  { %v144_v46 = vsel %vm138_vm0, %v114_v40, 0.0 }
  0x28   :  { %v143_v47 = vadd.f32 %v142_v43, %v141_v44 }
  0x2a   :  { %v145_v50 = vadd.f32 %v144_v46, %v143_v47 }
  0x2c   :  { %v147_v52 = vadd.f32 %v146_v49, %v145_v50 }
  0x2e   :  { %v149_v54 = vadd.f32 %v148_v51, %v147_v52 }
  0x30   :  { %v152_v55 = vadd.f32 %v151_v53, %v149_v54 }
  0x32   :  { %153 = vadd.xlane.f32.xlu0 %v152_v55 }
  0xbf   :  { %v154_v57 = vpop.xlane.xlu0 %153 }
  0xc0   :  { %v157_v58 = vadd.f32 %v156_v56, %v154_v57 }
  0xc2   :  { %159 = vst.msk [vmem:[%s243_s3] sm:$0x3] %vm158_vm2, %v157_v58 }
  0xc3   :  { %164 = vsyncpa [#allocation4], 1 }

</bundles_post_ra>
